<compile_context>
chip_gen: v7x
topology: tpu7x:2x2x1
jax: 0.10.0
libtpu: 0.0.40
codegen_flags: <defaults>
</compile_context>

<pallas_src>
import numpy as np
import jax
import jax.numpy as jnp
from jax.experimental import pallas as pl
from jax.experimental.pallas import tpu as pltpu

LANES = 128  # vreg lane width / packed slab width


# ----------------------------- mask construction -----------------------------

def _get_input_degrees(in_features):
    return np.arange(1, in_features + 1)


def _hidden_mask_and_degrees(in_degrees, out_features, autoregressive_features):
    max_ = max(1, autoregressive_features - 1)
    min_ = min(1, autoregressive_features - 1)
    out_degrees = np.arange(out_features) % max_ + min_
    mask = (out_degrees[:, None] >= in_degrees[None, :]).astype(np.float32)
    return mask, out_degrees


def _output_mask_and_degrees(in_degrees, out_features, autoregressive_features):
    multiplier = out_features // autoregressive_features
    out_degrees = np.repeat(_get_input_degrees(autoregressive_features), multiplier)
    mask = (out_degrees[:, None] > in_degrees[None, :]).astype(np.float32)
    return mask, out_degrees


# --------------------------------- kernel ------------------------------------

def made_kernel(x_ref, w_ref, o_ref):
    """x_ref: (TB, 128) augmented activations (1.0 carried in column BIAS_ROW).
    w_ref:  (6, 128, 128) packed weight slabs (bias folded into row BIAS_ROW).
    o_ref:  (TB, 128) lane-dense output (real data in the first out_dim lanes).
    """
    # initial masked linear (bias folded via the ones-column)
    temps = jnp.dot(x_ref[...], w_ref[0], preferred_element_type=jnp.float32)

    # two masked residual blocks (statically unrolled)
    for base in (1, 3):
        t = jnp.maximum(temps, 0.0)
        t = jnp.dot(t, w_ref[base], preferred_element_type=jnp.float32)
        t = jnp.maximum(t, 0.0)
        t = jnp.dot(t, w_ref[base + 1], preferred_element_type=jnp.float32)
        temps = temps + t
        # TODO(synk): dropout_probability=0.0 and use_batch_norm=False in the
        # reference module, so dropout / batch-norm are identity here.

    # final masked (output) linear, zero-padded to 128 lanes
    o_ref[...] = jnp.dot(temps, w_ref[5], preferred_element_type=jnp.float32)


def _round_up(a, b):
    return (a + b - 1) // b * b


def made_forward_pallas(x, wpack, bias_row, out_dim):
    B, F = x.shape
    n_layers = wpack.shape[0]

    # batch tiling: pad to sublane multiple; TB >= 256 once batch is large
    b_pad = _round_up(max(B, 8), 8)
    if b_pad > 256:
        tb = 256
        b_pad = _round_up(b_pad, tb)
    else:
        tb = b_pad

    # augmented input: features in lanes [0:F), constant 1.0 in lane bias_row
    x_aug = jnp.zeros((b_pad, LANES), jnp.float32)
    x_aug = x_aug.at[:B, :F].set(x.astype(jnp.float32))
    x_aug = x_aug.at[:, bias_row].set(1.0)

    out = pl.pallas_call(
        made_kernel,
        out_shape=jax.ShapeDtypeStruct((b_pad, LANES), jnp.float32),
        grid=(b_pad // tb,),
        in_specs=[
            pl.BlockSpec((tb, LANES), lambda i: (i, 0)),               # x tiled on batch
            pl.BlockSpec((n_layers, LANES, LANES), lambda i: (0, 0, 0)),  # weights resident
        ],
        out_specs=pl.BlockSpec((tb, LANES), lambda i: (i, 0)),
        compiler_params=pltpu.CompilerParams(
            dimension_semantics=("parallel",)),
    )(x_aug, wpack)
    return out[:B, :out_dim]


# ---------------------- parameter setup & slab packing -----------------------

def build_params(features, hidden_features, num_mixture_components, key,
                 epsilon=0.01, custom_initialization=True):
    """Returns a flat list of 12 arrays:
    [W0t, b0, Wa0t, ba0, Wb0t, bb0, Wa1t, ba1, Wb1t, bb1, Wft, bf]
    where each W*t is the mask-premultiplied weight transposed to (in, out)."""
    K = num_mixture_components
    out_dim = features * 3 * K

    keys = jax.random.split(key, 16)
    ki = iter(range(16))

    def linear_init(k, out_f, in_f):
        bound = 1.0 / np.sqrt(in_f)
        kw, kb = jax.random.split(k)
        w = jax.random.uniform(kw, (out_f, in_f), jnp.float32, -bound, bound)
        b = jax.random.uniform(kb, (out_f,), jnp.float32, -bound, bound)
        return w, b

    # ---- initial masked linear: features -> hidden ----
    in_deg = _get_input_degrees(features)
    mask0, deg0 = _hidden_mask_and_degrees(in_deg, hidden_features, features)
    W0, b0 = linear_init(keys[next(ki)], hidden_features, features)

    # ---- 2 masked residual blocks (hidden -> hidden, twice each) ----
    blocks = []
    prev_deg = deg0
    for _ in range(2):
        mask_a, deg_a = _hidden_mask_and_degrees(prev_deg, hidden_features, features)
        Wa, ba = linear_init(keys[next(ki)], hidden_features, hidden_features)
        mask_b, deg_b = _hidden_mask_and_degrees(deg_a, hidden_features, features)
        # zero_initialization=True on second linear of the residual block
        kz = keys[next(ki)]
        kzw, kzb = jax.random.split(kz)
        Wb = jax.random.uniform(kzw, (hidden_features, hidden_features),
                                jnp.float32, -1e-3, 1e-3)
        bb = jax.random.uniform(kzb, (hidden_features,), jnp.float32, -1e-3, 1e-3)
        # residual-block degree check (as in the PyTorch module)
        assert np.all(deg_b >= prev_deg)
        blocks.append((mask_a, Wa, ba, mask_b, Wb, bb))
        prev_deg = deg_b

    # ---- final masked linear: hidden -> features * 3K (is_output=True) ----
    mask_f, _ = _output_mask_and_degrees(prev_deg, out_dim, features)
    Wf, bf = linear_init(keys[next(ki)], out_dim, hidden_features)

    if custom_initialization:
        kf = jax.random.split(keys[next(ki)], 4)
        n_lm = features * K
        Wf = Wf.at[0::3, :].set(
            epsilon * jax.random.normal(kf[0], (n_lm, hidden_features), jnp.float32))
        bf = bf.at[0::3].set(epsilon * jax.random.normal(kf[1], (n_lm,), jnp.float32))
        Wf = Wf.at[2::3, :].set(
            epsilon * jax.random.normal(kf[2], (n_lm, hidden_features), jnp.float32))
        bf = bf.at[2::3].set(
            np.log(np.exp(1.0 - epsilon) - 1.0)
            + epsilon * jax.random.normal(kf[3], (n_lm,), jnp.float32))

    def pack(W, mask, b):
        return [jnp.asarray((W * mask).T, jnp.float32), jnp.asarray(b, jnp.float32)]

    p = []
    p += pack(W0, mask0, b0)
    for (mask_a, Wa, ba, mask_b, Wb, bb) in blocks:
        p += pack(Wa, mask_a, ba)
        p += pack(Wb, mask_b, bb)
    p += pack(Wf, mask_f, bf)
    return p


def pack_slabs(params, bias_row):
    """Pack 6 (weight, bias) pairs into one (6, 128, 128) f32 buffer.

    Slab layout: rows [0:in_dim) = premasked transposed weight, row `bias_row`
    = bias (padded to 128 lanes), column `bias_row` = unit vector e_{bias_row}
    for layers that must carry the constant 1.0 forward (layer 0 and the first
    linear of each residual block); the second linear of each block and the
    output layer leave that column zero so the residual add keeps the 1.0.
    """
    carries = [True, True, False, True, False, False]
    slabs = []
    for li in range(6):
        Wt = np.asarray(params[2 * li], np.float32)
        b = np.asarray(params[2 * li + 1], np.float32).reshape(-1)
        in_dim, out_dim = Wt.shape
        assert in_dim <= bias_row < LANES and out_dim <= LANES
        if carries[li]:
            assert out_dim <= bias_row
        s = np.zeros((LANES, LANES), np.float32)
        s[:in_dim, :out_dim] = Wt
        s[bias_row, :out_dim] = b
        if carries[li]:
            s[bias_row, bias_row] = 1.0
        slabs.append(s)
    return jnp.asarray(np.stack(slabs, axis=0), jnp.float32)


# ------------------------------ pure-JAX reference ---------------------------

def made_forward_ref(x, params):
    (w0, b0, wa0, ba0, wb0, bb0, wa1, ba1, wb1, bb1, wf, bf) = params
    temps = x @ w0 + b0
    for wa, ba, wb, bb in ((wa0, ba0, wb0, bb0), (wa1, ba1, wb1, bb1)):
        t = jnp.maximum(temps, 0.0) @ wa + ba
        t = jnp.maximum(t, 0.0) @ wb + bb
        temps = temps + t
    return temps @ wf + bf


# ----------------------------------- main -------------------------------------

if __name__ == "__main__":
    features = 8
    hidden_features = 32
    num_mixture_components = 5
    batch = 2
    out_dim = features * 3 * num_mixture_components  # 120

    key = jax.random.PRNGKey(0)
    kx, kp = jax.random.split(key)

    x = jax.random.normal(kx, (batch, features), jnp.float32)
    params = build_params(features, hidden_features, num_mixture_components, kp)
    wpack = pack_slabs(params, bias_row=hidden_features)

    out = made_forward_pallas(x, wpack, bias_row=hidden_features, out_dim=out_dim)
    out = jax.block_until_ready(out)

    ref = made_forward_ref(x, params)
    assert out.shape == (batch, out_dim)
    np.testing.assert_allclose(np.asarray(out), np.asarray(ref), rtol=1e-5, atol=1e-5)

    print("KERNEL_OK")
</pallas_src>

<mosaic_0001>
module attributes {stable_mosaic.version = 11 : i64} {
  func.func @made_kernel(%arg0: i32, %arg1: memref<8x128xf32, #tpu.memory_space<vmem>>, %arg2: memref<6x128x128xf32, #tpu.memory_space<vmem>>, %arg3: memref<8x128xf32, #tpu.memory_space<vmem>>) attributes {dimension_semantics = [#tpu.dimension_semantics<parallel>], iteration_bounds = array<i64: 1>, scalar_prefetch = 0 : i64, scratch_operands = 0 : i64, tpu.core_type = #tpu.core_type<tc>, window_params = [{transform_indices = @transform_0, window_bounds = array<i64: 8, 128>}, {pipeline_mode = #tpu.pipeline_mode<synchronous>, transform_indices = @transform_1, window_bounds = array<i64: 6, 128, 128>}, {transform_indices = @transform_2, window_bounds = array<i64: 8, 128>}]} {
    %c0 = arith.constant 0 : index
    %c0_0 = arith.constant 0 : index
    %0 = vector.load %arg1[%c0, %c0_0] : memref<8x128xf32, #tpu.memory_space<vmem>>, vector<8x128xf32>
    %c0_1 = arith.constant 0 : index
    %c0_2 = arith.constant 0 : index
    %c0_3 = arith.constant 0 : index
    %1 = vector.load %arg2[%c0_1, %c0_2, %c0_3] : memref<6x128x128xf32, #tpu.memory_space<vmem>>, vector<1x128x128xf32>
    %2 = vector.shape_cast %1 : vector<1x128x128xf32> to vector<128x128xf32>
    %cst = arith.constant dense<0.000000e+00> : vector<8x128xf32>
    %3 = tpu.matmul %0, %2, %cst {dimension_numbers = #tpu.dot_dimension_numbers<[1], [0], [0], [1], [0, 0, 1, 1], [], []>} : vector<8x128xf32>, vector<128x128xf32>, vector<8x128xf32> -> vector<8x128xf32>
    %cst_4 = arith.constant 0.000000e+00 : f32
    %4 = vector.broadcast %cst_4 : f32 to vector<8x128xf32>
    %5 = arith.maximumf %3, %4 : vector<8x128xf32>
    %c1 = arith.constant 1 : index
    %c0_5 = arith.constant 0 : index
    %c0_6 = arith.constant 0 : index
    %6 = vector.load %arg2[%c1, %c0_5, %c0_6] : memref<6x128x128xf32, #tpu.memory_space<vmem>>, vector<1x128x128xf32>
    %7 = vector.shape_cast %6 : vector<1x128x128xf32> to vector<128x128xf32>
    %cst_7 = arith.constant dense<0.000000e+00> : vector<8x128xf32>
    %8 = tpu.matmul %5, %7, %cst_7 {dimension_numbers = #tpu.dot_dimension_numbers<[1], [0], [0], [1], [0, 0, 1, 1], [], []>} : vector<8x128xf32>, vector<128x128xf32>, vector<8x128xf32> -> vector<8x128xf32>
    %cst_8 = arith.constant 0.000000e+00 : f32
    %9 = vector.broadcast %cst_8 : f32 to vector<8x128xf32>
    %10 = arith.maximumf %8, %9 : vector<8x128xf32>
    %c2 = arith.constant 2 : index
    %c0_9 = arith.constant 0 : index
    %c0_10 = arith.constant 0 : index
    %11 = vector.load %arg2[%c2, %c0_9, %c0_10] : memref<6x128x128xf32, #tpu.memory_space<vmem>>, vector<1x128x128xf32>
    %12 = vector.shape_cast %11 : vector<1x128x128xf32> to vector<128x128xf32>
    %cst_11 = arith.constant dense<0.000000e+00> : vector<8x128xf32>
    %13 = tpu.matmul %10, %12, %cst_11 {dimension_numbers = #tpu.dot_dimension_numbers<[1], [0], [0], [1], [0, 0, 1, 1], [], []>} : vector<8x128xf32>, vector<128x128xf32>, vector<8x128xf32> -> vector<8x128xf32>
    %14 = arith.addf %3, %13 : vector<8x128xf32>
    %cst_12 = arith.constant 0.000000e+00 : f32
    %15 = vector.broadcast %cst_12 : f32 to vector<8x128xf32>
    %16 = arith.maximumf %14, %15 : vector<8x128xf32>
    %c3 = arith.constant 3 : index
    %c0_13 = arith.constant 0 : index
    %c0_14 = arith.constant 0 : index
    %17 = vector.load %arg2[%c3, %c0_13, %c0_14] : memref<6x128x128xf32, #tpu.memory_space<vmem>>, vector<1x128x128xf32>
    %18 = vector.shape_cast %17 : vector<1x128x128xf32> to vector<128x128xf32>
    %cst_15 = arith.constant dense<0.000000e+00> : vector<8x128xf32>
    %19 = tpu.matmul %16, %18, %cst_15 {dimension_numbers = #tpu.dot_dimension_numbers<[1], [0], [0], [1], [0, 0, 1, 1], [], []>} : vector<8x128xf32>, vector<128x128xf32>, vector<8x128xf32> -> vector<8x128xf32>
    %cst_16 = arith.constant 0.000000e+00 : f32
    %20 = vector.broadcast %cst_16 : f32 to vector<8x128xf32>
    %21 = arith.maximumf %19, %20 : vector<8x128xf32>
    %c4 = arith.constant 4 : index
    %c0_17 = arith.constant 0 : index
    %c0_18 = arith.constant 0 : index
    %22 = vector.load %arg2[%c4, %c0_17, %c0_18] : memref<6x128x128xf32, #tpu.memory_space<vmem>>, vector<1x128x128xf32>
    %23 = vector.shape_cast %22 : vector<1x128x128xf32> to vector<128x128xf32>
    %cst_19 = arith.constant dense<0.000000e+00> : vector<8x128xf32>
    %24 = tpu.matmul %21, %23, %cst_19 {dimension_numbers = #tpu.dot_dimension_numbers<[1], [0], [0], [1], [0, 0, 1, 1], [], []>} : vector<8x128xf32>, vector<128x128xf32>, vector<8x128xf32> -> vector<8x128xf32>
    %25 = arith.addf %14, %24 : vector<8x128xf32>
    %c5 = arith.constant 5 : index
    %c0_20 = arith.constant 0 : index
    %c0_21 = arith.constant 0 : index
    %26 = vector.load %arg2[%c5, %c0_20, %c0_21] : memref<6x128x128xf32, #tpu.memory_space<vmem>>, vector<1x128x128xf32>
    %27 = vector.shape_cast %26 : vector<1x128x128xf32> to vector<128x128xf32>
    %cst_22 = arith.constant dense<0.000000e+00> : vector<8x128xf32>
    %28 = tpu.matmul %25, %27, %cst_22 {dimension_numbers = #tpu.dot_dimension_numbers<[1], [0], [0], [1], [0, 0, 1, 1], [], []>} : vector<8x128xf32>, vector<128x128xf32>, vector<8x128xf32> -> vector<8x128xf32>
    %c0_23 = arith.constant 0 : index
    %c0_24 = arith.constant 0 : index
    %29 = vector.load %arg3[%c0_23, %c0_24] : memref<8x128xf32, #tpu.memory_space<vmem>>, vector<8x128xf32>
    tpu.vector_store %arg3[%c0_23, %c0_24], %28 {strides = array<i32>} : memref<8x128xf32, #tpu.memory_space<vmem>>, vector<8x128xf32>,
    return
  }
  func.func @transform_0(%arg0: i32) -> (i32, i32) {
    %c0_i32 = arith.constant 0 : i32
    %c0_i32_0 = arith.constant 0 : i32
    return %arg0, %c0_i32 : i32, i32
  }
  func.func @transform_1(%arg0: i32) -> (i32, i32, i32) {
    %c0_i32 = arith.constant 0 : i32
    %c0_i32_0 = arith.constant 0 : i32
    %c0_i32_1 = arith.constant 0 : i32
    %c0_i32_2 = arith.constant 0 : i32
    return %c0_i32, %c0_i32_0, %c0_i32_1 : i32, i32, i32
  }
  func.func @transform_2(%arg0: i32) -> (i32, i32) {
    %c0_i32 = arith.constant 0 : i32
    %c0_i32_0 = arith.constant 0 : i32
    return %arg0, %c0_i32 : i32, i32
  }
}

</mosaic_0001>

<bundles_post_ra>
// kernel: tpu_custom_call.1
= control target key start
LH: loop header
LB: loop body
LE: loop exit
PB: predicated region body
PF: predicated region fallthrough
CT: control target
= control target key end

     0   :  { %7 = vsyncpa [#allocation3], 0  ;;  %s1249_s0 = inlined_call_operand.hbm [shape: f32[8,128], index: 0, kind: input, shape index: {}]   ;;  %s1250_s1 = inlined_call_operand.hbm [shape: f32[6,128,128], index: 1, kind: input, shape index: {}]   ;;  %s1251_s2 = inlined_call_operand.hbm [shape: f32[8,128], index: 2, kind: output, shape index: {}]  }
   0x1   :  { %8 = vsyncpa [#allocation6], 0 }
   0x2   :  { %9 = vsyncpa [#allocation4], 0  ;;  %s1119_s9 = smov [#allocation2]   ;;  %s1120_s11 = smov [#allocation5]  }
   0x3   :  { %s16_s10 = sshll.u32 %s1119_s9, 4  ;;  %s25_s12 = sshll.u32 %s1120_s11, 4  ;;  %s17_s10 = int_to_ptr.vmem [resolvable:$true] %s16_s10  ;;  %s1142_s12 = int_to_ptr.vmem [resolvable:$true] %s25_s12 }
   0x4   :  { %s1047_s15 = scalar_lea.hbm %s1249_s0, 128 }
   0x5   :  { %p1048_p0 = scmp.ne.s32.totalorder %s1249_s0, %s1047_s15  ;;  %p1051_p1 = scmp.lt.u32.totalorder %s1047_s15, %s1249_s0 }
   0x7   :  { %p1053_p2 = pnand %p1051_p1, %p1048_p0 }
   0x9   :  { %1056 = shalt.err (!%p1053_p2)
}
   0xa   :  { %s1057_s20 = scalar_lea.vmem %s17_s10, 128  ;;  %p1062_p4 = scmp.lt.s32.totalorder %s17_s10, %s17_s10 }
   0xb   :  { %p1058_p3 = scmp.ne.s32.totalorder %s17_s10, %s1057_s20  ;;  %p1063_p5 = scmp.lt.s32.totalorder %s1057_s20, %s1057_s20 }
   0xd   :  { %p1064_p6 = por %p1063_p5, %p1062_p4 }
   0xf   :  { %p1065_p7 = pnand %p1064_p6, %p1058_p3 }
  0x11   :  { %1068 = shalt.err (!%p1065_p7)
}
  0x12   :  { %19 = dma.hbm_to_vmem [thread:$0]  %s1249_s0, 128, %s17_s10, [#allocation3]  }
  0x13   :  { %s1069_s25 = scalar_lea.hbm %s1250_s1, 12288 }
  0x14   :  { %p1070_p8 = scmp.ne.s32.totalorder %s1250_s1, %s1069_s25  ;;  %p1073_p9 = scmp.lt.u32.totalorder %s1069_s25, %s1250_s1 }
  0x16   :  { %p1075_p10 = pnand %p1073_p9, %p1070_p8 }
  0x18   :  { %1078 = shalt.err (!%p1075_p10)
}
  0x19   :  { %s1079_s30 = scalar_lea.vmem %s1142_s12, 12288  ;;  %p1084_p12 = scmp.lt.s32.totalorder %s1142_s12, %s1142_s12 }
  0x1a   :  { %p1080_p11 = scmp.ne.s32.totalorder %s1142_s12, %s1079_s30  ;;  %p1085_p13 = scmp.lt.s32.totalorder %s1079_s30, %s1079_s30 }
  0x1c   :  { %p1086_p0 = por %p1085_p13, %p1084_p12 }
  0x1e   :  { %p1087_p1 = pnand %p1086_p0, %p1080_p11 }
  0x20   :  { %1090 = shalt.err (!%p1087_p1)
}
  0x21   :  { %s1121_s0 = smov 128   ;;  %s1122_s3 = smov 8  }
  0x22   :  { %31 = dma.hbm_to_vmem [thread:$0]  %s1250_s1, 12288, %s1142_s12, [#allocation6], %s1121_s0, %s1121_s0, %s1122_s3  }
  0x23   :  { %1113 = dma.done.wait [#allocation3], 128  }
  0x24   :  { %1114 = vsyncadd [#allocation3], 4294967168 }
  0x25   :  { %1115 = dma.done.wait [#allocation6], 12288  }
  0x26   :  { %1116 = vsyncadd [#allocation6], 4294955008  ;;  %v1123_v0 = vmov 0.0|0.0   ;;  %vm1124_vm0 = vmmov 0   ;;  %v1125_v1 = vmov 0.0   ;;  %v39_v2 = vld [vmem:[#allocation5] sm:$0xff] }
  0x27   :  { %895 = vmatprep.subr.bf16.mxu0 %v1123_v0  ;;  %717 = vmatprep.mubr.msk.f32.mxu0 %vm1124_vm0, %v1125_v1  ;;  %v40_v3 = vld [vmem:[#allocation5 + $0x8] sm:$0xff]  ;;  %v41_v4 = vld [vmem:[#allocation5 + $0x10] sm:$0xff]  ;;  %v42_v6 = vld [vmem:[#allocation5 + $0x18] sm:$0xff]  ;;  %s1126_s1 = smov [#allocation7]  }
  0x28   :  { %919 = vmatprep.subr.bf16.mxu1 %v1123_v0  ;;  %752 = vmatprep.mubr.msk.f32.mxu1 %vm1124_vm0, %v1125_v1  ;;  %v896_v5 = vpack.c.bf16 %v40_v3, %v39_v2  ;;  %v899_v7 = vpack.c.bf16 %v42_v6, %v41_v4  ;;  %v43_v8 = vld [vmem:[#allocation5 + $0x20] sm:$0xff]  ;;  %v44_v9 = vld [vmem:[#allocation5 + $0x28] sm:$0xff]  ;;  %v129_v12 = vld [vmem:[#allocation5 + $0x90] sm:$0xff]  ;;  %s573_s6 = sshll.u32 %s1126_s1, 4  ;;  %s574_s6 = int_to_ptr.vmem [resolvable:$true] %s573_s6 }
  0x29   :  { %v127_v10 = vld [vmem:[#allocation5 + $0x80] sm:$0xff]  ;;  %v128_v11 = vld [vmem:[#allocation5 + $0x88] sm:$0xff]  ;;  %v130_v13 = vld [vmem:[#allocation5 + $0x98] sm:$0xff]  ;;  %v902_v14 = vpack.c.bf16 %v44_v9, %v43_v8  ;;  %s1091_s7 = scalar_lea.vmem %s574_s6, 128  ;;  %p1096_p3 = scmp.lt.s32.totalorder %s574_s6, %s574_s6 }
  0x2a   :  { %897 = vmatpush3.bf16.msra.mxu0 %v896_v5  ;;  %v920_v15 = vpack.c.bf16 %v128_v11, %v127_v10  ;;  %v45_v16 = vld [vmem:[#allocation5 + $0x30] sm:$0xff]  ;;  %v46_v17 = vld [vmem:[#allocation5 + $0x38] sm:$0xff]  ;;  %v923_v18 = vpack.c.bf16 %v130_v13, %v129_v12  ;;  %v131_v19 = vld [vmem:[#allocation5 + $0xa0] sm:$0xff]  ;;  %p1092_p2 = scmp.ne.s32.totalorder %s574_s6, %s1091_s7  ;;  %p1097_p4 = scmp.lt.s32.totalorder %s1091_s7, %s1091_s7 }
  0x2b   :  { %898 = vmatprep.subr.bf16.mxu0 %v1123_v0  ;;  %v132_v20 = vld [vmem:[#allocation5 + $0xa8] sm:$0xff]  ;;  %v905_v21 = vpack.c.bf16 %v46_v17, %v45_v16  ;;  %v47_v22 = vld [vmem:[#allocation5 + $0x40] sm:$0xff]  ;;  %v133_v25 = vld [vmem:[#allocation5 + $0xb0] sm:$0xff] }
  0x2c   :  { %921 = vmatpush3.bf16.msra.mxu1 %v920_v15  ;;  %v48_v23 = vld [vmem:[#allocation5 + $0x48] sm:$0xff]  ;;  %v926_v24 = vpack.c.bf16 %v132_v20, %v131_v19  ;;  %v134_v26 = vld [vmem:[#allocation5 + $0xb8] sm:$0xff]  ;;  %v49_v28 = vld [vmem:[#allocation5 + $0x50] sm:$0xff]  ;;  %p1098_p5 = por %p1097_p4, %p1096_p3 }
  0x2d   :  { %922 = vmatprep.subr.bf16.mxu1 %v1123_v0  ;;  %v908_v27 = vpack.c.bf16 %v48_v23, %v47_v22  ;;  %v50_v29 = vld [vmem:[#allocation5 + $0x58] sm:$0xff]  ;;  %v929_v30 = vpack.c.bf16 %v134_v26, %v133_v25  ;;  %v135_v31 = vld [vmem:[#allocation5 + $0xc0] sm:$0xff]  ;;  %v136_v32 = vld [vmem:[#allocation5 + $0xc8] sm:$0xff] }
  0x2e   :  { %900 = vmatpush3.bf16.msra.mxu0 %v899_v7  ;;  %v911_v33 = vpack.c.bf16 %v50_v29, %v49_v28  ;;  %v51_v34 = vld [vmem:[#allocation5 + $0x60] sm:$0xff]  ;;  %v52_v35 = vld [vmem:[#allocation5 + $0x68] sm:$0xff]  ;;  %v932_v36 = vpack.c.bf16 %v136_v32, %v135_v31  ;;  %v137_v37 = vld [vmem:[#allocation5 + $0xd0] sm:$0xff]  ;;  %p1099_p6 = pnand %p1098_p5, %p1092_p2 }
  0x2f   :  { %901 = vmatprep.subr.bf16.mxu0 %v1123_v0  ;;  %v138_v38 = vld [vmem:[#allocation5 + $0xd8] sm:$0xff]  ;;  %v914_v39 = vpack.c.bf16 %v52_v35, %v51_v34  ;;  %v53_v40 = vld [vmem:[#allocation5 + $0x70] sm:$0xff]  ;;  %v139_v43 = vld [vmem:[#allocation5 + $0xe0] sm:$0xff] }
  0x30   :  { %924 = vmatpush3.bf16.msra.mxu1 %v923_v18  ;;  %v54_v41 = vld [vmem:[#allocation5 + $0x78] sm:$0xff]  ;;  %v935_v42 = vpack.c.bf16 %v138_v38, %v137_v37  ;;  %v140_v44 = vld [vmem:[#allocation5 + $0xe8] sm:$0xff]  ;;  %v141_v48 = vld [vmem:[#allocation5 + $0xf0] sm:$0xff] }
  0x31   :  { %925 = vmatprep.subr.bf16.mxu1 %v1123_v0  ;;  %v917_v45 = vpack.c.bf16 %v54_v41, %v53_v40  ;;  %v938_v46 = vpack.c.bf16 %v140_v44, %v139_v43  ;;  %v38_v47 = vld [vmem:[#allocation2] sm:$0xff]  ;;  %v215_v51 = vld [vmem:[#allocation5 + $0x100] sm:$0xff]  ;;  %v216_v52 = vld [vmem:[#allocation5 + $0x108] sm:$0xff] }
  0x32   :  { %903 = vmatpush3.bf16.msra.mxu0 %v902_v14  ;;  %v142_v49 = vld [vmem:[#allocation5 + $0xf8] sm:$0xff]  ;;  %v217_v53 = vld [vmem:[#allocation5 + $0x110] sm:$0xff]  ;;  %v944_v54 = vpack.c.bf16 %v216_v52, %v215_v51  ;;  %v219_v57 = vld [vmem:[#allocation5 + $0x120] sm:$0xff] }
  0x33   :  { %904 = vmatprep.subr.bf16.mxu0 %v1123_v0  ;;  %v941_v50 = vpack.c.bf16 %v142_v49, %v141_v48  ;;  %v218_v55 = vld [vmem:[#allocation5 + $0x118] sm:$0xff]  ;;  %v220_v58 = vld [vmem:[#allocation5 + $0x128] sm:$0xff]  ;;  %v221_v60 = vld [vmem:[#allocation5 + $0x130] sm:$0xff] }
  0x34   :  { %927 = vmatpush3.bf16.msra.mxu1 %v926_v24  ;;  %v947_v56 = vpack.c.bf16 %v218_v55, %v217_v53  ;;  %v950_v59 = vpack.c.bf16 %v220_v58, %v219_v57  ;;  %v222_v61 = vld [vmem:[#allocation5 + $0x138] sm:$0xff]  ;;  %v223_v63 = vld [vmem:[#allocation5 + $0x140] sm:$0xff]  ;;  %v224_v2 = vld [vmem:[#allocation5 + $0x148] sm:$0xff] }
  0x35   :  { %928 = vmatprep.subr.bf16.mxu1 %v1123_v0  ;;  %v953_v62 = vpack.c.bf16 %v222_v61, %v221_v60  ;;  %v956_v3 = vpack.c.bf16 %v224_v2, %v223_v63  ;;  %v225_v4 = vld [vmem:[#allocation5 + $0x150] sm:$0xff]  ;;  %v226_v5 = vld [vmem:[#allocation5 + $0x158] sm:$0xff]  ;;  %v227_v7 = vld [vmem:[#allocation5 + $0x160] sm:$0xff] }
  0x36   :  { %906 = vmatpush3.bf16.msra.mxu0 %v905_v21  ;;  %v959_v6 = vpack.c.bf16 %v226_v5, %v225_v4  ;;  %v228_v8 = vld [vmem:[#allocation5 + $0x168] sm:$0xff]  ;;  %v229_v13 = vld [vmem:[#allocation5 + $0x170] sm:$0xff]  ;;  %v230_v14 = vld [vmem:[#allocation5 + $0x178] sm:$0xff] }
  0x37   :  { %907 = vmatprep.subr.bf16.mxu0 %v1123_v0  ;;  %v962_v9 = vpack.c.bf16 %v228_v8, %v227_v7  ;;  %v965_v15 = vpack.c.bf16 %v230_v14, %v229_v13  ;;  %v304_v16 = vld [vmem:[#allocation5 + $0x180] sm:$0xff]  ;;  %v305_v17 = vld [vmem:[#allocation5 + $0x188] sm:$0xff]  ;;  %v306_v18 = vld [vmem:[#allocation5 + $0x190] sm:$0xff] }
  0x38   :  { %930 = vmatpush3.bf16.msra.mxu1 %v929_v30  ;;  %v968_v19 = vpack.c.bf16 %v305_v17, %v304_v16  ;;  %v307_v20 = vld [vmem:[#allocation5 + $0x198] sm:$0xff]  ;;  %v308_v22 = vld [vmem:[#allocation5 + $0x1a0] sm:$0xff]  ;;  %v309_v23 = vld [vmem:[#allocation5 + $0x1a8] sm:$0xff] }
  0x39   :  { %931 = vmatprep.subr.bf16.mxu1 %v1123_v0  ;;  %v971_v21 = vpack.c.bf16 %v307_v20, %v306_v18  ;;  %v974_v24 = vpack.c.bf16 %v309_v23, %v308_v22  ;;  %v310_v25 = vld [vmem:[#allocation5 + $0x1b0] sm:$0xff]  ;;  %v311_v26 = vld [vmem:[#allocation5 + $0x1b8] sm:$0xff]  ;;  %v312_v28 = vld [vmem:[#allocation5 + $0x1c0] sm:$0xff] }
  0x3a   :  { %909 = vmatpush3.bf16.msra.mxu0 %v908_v27  ;;  %v977_v27 = vpack.c.bf16 %v311_v26, %v310_v25  ;;  %v313_v29 = vld [vmem:[#allocation5 + $0x1c8] sm:$0xff]  ;;  %v314_v31 = vld [vmem:[#allocation5 + $0x1d0] sm:$0xff]  ;;  %v315_v32 = vld [vmem:[#allocation5 + $0x1d8] sm:$0xff] }
  0x3b   :  { %910 = vmatprep.subr.bf16.mxu0 %v1123_v0  ;;  %v980_v30 = vpack.c.bf16 %v313_v29, %v312_v28  ;;  %v316_v34 = vld [vmem:[#allocation5 + $0x1e0] sm:$0xff]  ;;  %v317_v35 = vld [vmem:[#allocation5 + $0x1e8] sm:$0xff]  ;;  %v318_v40 = vld [vmem:[#allocation5 + $0x1f0] sm:$0xff] }
  0x3c   :  { %933 = vmatpush3.bf16.msra.mxu1 %v932_v36  ;;  %v986_v36 = vpack.c.bf16 %v317_v35, %v316_v34  ;;  %v319_v41 = vld [vmem:[#allocation5 + $0x1f8] sm:$0xff]  ;;  %v392_v43 = vld [vmem:[#allocation5 + $0x200] sm:$0xff]  ;;  %v393_v44 = vld [vmem:[#allocation5 + $0x208] sm:$0xff] }
  0x3d   :  { %934 = vmatprep.subr.bf16.mxu1 %v1123_v0  ;;  %v396_v49 = vld [vmem:[#allocation5 + $0x220] sm:$0xff]  ;;  %v398_v52 = vld [vmem:[#allocation5 + $0x230] sm:$0xff]  ;;  %v399_v53 = vld [vmem:[#allocation5 + $0x238] sm:$0xff] }
  0x3e   :  { %912 = vmatpush3.bf16.msra.mxu0 %v911_v33  ;;  %v983_v33 = vpack.c.bf16 %v315_v32, %v314_v31  ;;  %v400_v55 = vld [vmem:[#allocation5 + $0x240] sm:$0xff]  ;;  %v402_v58 = vld [vmem:[#allocation5 + $0x250] sm:$0xff]  ;;  %v407_v7 = vld [vmem:[#allocation5 + $0x278] sm:$0xff] }
  0x3f   :  { %913 = vmatprep.subr.bf16.mxu0 %v1123_v0  ;;  %v404_v61 = vld [vmem:[#allocation5 + $0x260] sm:$0xff]  ;;  %v483_v14 = vld [vmem:[#allocation5 + $0x298] sm:$0xff]  ;;  %v485_v16 = vld [vmem:[#allocation5 + $0x2a8] sm:$0xff] }
  0x40   :  { %936 = vmatpush3.bf16.msra.mxu1 %v935_v42  ;;  %v989_v42 = vpack.c.bf16 %v319_v41, %v318_v40  ;;  %v487_v18 = vld [vmem:[#allocation5 + $0x2b8] sm:$0xff]  ;;  %v488_v20 = vld [vmem:[#allocation5 + $0x2c0] sm:$0xff]  ;;  %v490_v23 = vld [vmem:[#allocation5 + $0x2d0] sm:$0xff] }
  0x41   :  { %937 = vmatprep.subr.bf16.mxu1 %v1123_v0  ;;  %v492_v26 = vld [vmem:[#allocation5 + $0x2e0] sm:$0xff]  ;;  %v494_v32 = vld [vmem:[#allocation5 + $0x2f0] sm:$0xff] }
  0x42   :  { %915 = vmatpush3.bf16.msra.mxu0 %v914_v39 }
  0x43   :  { %916 = vmatprep.subr.bf16.mxu0 %v1123_v0 }
  0x44   :  { %939 = vmatpush3.bf16.msra.mxu1 %v938_v46  ;;  %v992_v46 = vpack.c.bf16 %v393_v44, %v392_v43 }
  0x45   :  { %940 = vmatprep.subr.bf16.mxu1 %v1123_v0 }
  0x46   :  { %918 = vmatpush3.bf16.msra.mxu0 %v917_v45  ;;  %v394_v45 = vld [vmem:[#allocation5 + $0x210] sm:$0xff] }
  0x47   :  { %943 = vmatprep.subr.bf16.mxu0 %v1123_v0 }
  0x48   :  { %942 = vmatpush3.bf16.msra.mxu1 %v941_v50  ;;  %v397_v50 = vld [vmem:[#allocation5 + $0x228] sm:$0xff] }
  0x49   :  { %718 = vmatmul.mubr.f32.vlgmr.msra.gmra.mrb[0].mxu0 %v38_v47  ;;  %967 = vmatprep.subr.bf16.mxu1 %v1123_v0  ;;  %v395_v47 = vld [vmem:[#allocation5 + $0x218] sm:$0xff]  ;;  %v998_v51 = vpack.c.bf16 %v397_v50, %v396_v49 }
  0x4a   :  { %787 = vmatprep.mubr.msk.f32.mxu0 %vm1124_vm0, %v1125_v1  ;;  %945 = vmatpush3.bf16.msra.mxu0 %v944_v54  ;;  %v995_v48 = vpack.c.bf16 %v395_v47, %v394_v45  ;;  %v1001_v54 = vpack.c.bf16 %v399_v53, %v398_v52 }
  0x4b   :  { %946 = vmatprep.subr.bf16.mxu0 %v1123_v0 }
  0x4e   :  { %948 = vmatpush3.bf16.msra.mxu0 %v947_v56  ;;  %v401_v56 = vld [vmem:[#allocation5 + $0x248] sm:$0xff] }
  0x4f   :  { %949 = vmatprep.subr.bf16.mxu0 %v1123_v0  ;;  %v1004_v57 = vpack.c.bf16 %v401_v56, %v400_v55 }
  0x52   :  { %951 = vmatpush3.bf16.msra.mxu0 %v950_v59  ;;  %v403_v59 = vld [vmem:[#allocation5 + $0x258] sm:$0xff] }
  0x53   :  { %952 = vmatprep.subr.bf16.mxu0 %v1123_v0  ;;  %v1007_v60 = vpack.c.bf16 %v403_v59, %v402_v58 }
  0x56   :  { %954 = vmatpush3.bf16.msra.mxu0 %v953_v62  ;;  %v405_v62 = vld [vmem:[#allocation5 + $0x268] sm:$0xff] }
  0x57   :  { %955 = vmatprep.subr.bf16.mxu0 %v1123_v0  ;;  %v1010_v63 = vpack.c.bf16 %v405_v62, %v404_v61 }
  0x5a   :  { %957 = vmatpush3.bf16.msra.mxu0 %v956_v3 }
  0x5b   :  { %958 = vmatprep.subr.bf16.mxu0 %v1123_v0 }
  0x5e   :  { %960 = vmatpush3.bf16.msra.mxu0 %v959_v6  ;;  %v406_v6 = vld [vmem:[#allocation5 + $0x270] sm:$0xff] }
  0x5f   :  { %961 = vmatprep.subr.bf16.mxu0 %v1123_v0  ;;  %v1013_v8 = vpack.c.bf16 %v407_v7, %v406_v6 }
  0x62   :  { %963 = vmatpush3.bf16.msra.mxu0 %v962_v9  ;;  %v480_v9 = vld [vmem:[#allocation5 + $0x280] sm:$0xff] }
  0x63   :  { %964 = vmatprep.subr.bf16.mxu0 %v1123_v0 }
  0x66   :  { %966 = vmatpush3.bf16.msra.mxu0 %v965_v15 }
  0x67   :  { %991 = vmatprep.subr.bf16.mxu0 %v1123_v0 }
 0x11c   :  { %v1204_v10 = vpop.f32.mrb[0].mxu0 }
 0x11d   :  { %v125_v11 = vmax.f32 %v1204_v10, 0.0  ;;  %v719_v12 = vpop.f32.mrb[1].mxu0 }
 0x11e   :  { %v482_v12 = vld [vmem:[#allocation5 + $0x290] sm:$0xff] }
 0x11f   :  { %753 = vmatmul.mubr.f32.vlgmr.msra.gmra.mrb[0].mxu1 %v125_v11  ;;  %v481_v11 = vld [vmem:[#allocation5 + $0x288] sm:$0xff]  ;;  %v1019_v15 = vpack.c.bf16 %v483_v14, %v482_v12 }
 0x120   :  { %822 = vmatprep.mubr.msk.f32.mxu1 %vm1124_vm0, %v1125_v1  ;;  %969 = vmatpush3.bf16.msra.mxu1 %v968_v19  ;;  %v1016_v13 = vpack.c.bf16 %v481_v11, %v480_v9 }
 0x121   :  { %970 = vmatprep.subr.bf16.mxu1 %v1123_v0 }
 0x124   :  { %972 = vmatpush3.bf16.msra.mxu1 %v971_v21  ;;  %v489_v21 = vld [vmem:[#allocation5 + $0x2c8] sm:$0xff] }
 0x125   :  { %973 = vmatprep.subr.bf16.mxu1 %v1123_v0  ;;  %v1028_v22 = vpack.c.bf16 %v489_v21, %v488_v20 }
 0x128   :  { %975 = vmatpush3.bf16.msra.mxu1 %v974_v24  ;;  %v491_v24 = vld [vmem:[#allocation5 + $0x2d8] sm:$0xff] }
 0x129   :  { %976 = vmatprep.subr.bf16.mxu1 %v1123_v0  ;;  %v1031_v25 = vpack.c.bf16 %v491_v24, %v490_v23 }
 0x12c   :  { %978 = vmatpush3.bf16.msra.mxu1 %v977_v27  ;;  %v493_v27 = vld [vmem:[#allocation5 + $0x2e8] sm:$0xff] }
 0x12d   :  { %979 = vmatprep.subr.bf16.mxu1 %v1123_v0  ;;  %v1034_v28 = vpack.c.bf16 %v493_v27, %v492_v26 }
 0x130   :  { %981 = vmatpush3.bf16.msra.mxu1 %v980_v30 }
 0x131   :  { %982 = vmatprep.subr.bf16.mxu1 %v1123_v0 }
 0x134   :  { %984 = vmatpush3.bf16.msra.mxu1 %v983_v33  ;;  %v495_v33 = vld [vmem:[#allocation5 + $0x2f8] sm:$0xff] }
 0x135   :  { %985 = vmatprep.subr.bf16.mxu1 %v1123_v0  ;;  %v1037_v34 = vpack.c.bf16 %v495_v33, %v494_v32 }
 0x138   :  { %987 = vmatpush3.bf16.msra.mxu1 %v986_v36 }
 0x139   :  { %988 = vmatprep.subr.bf16.mxu1 %v1123_v0 }
 0x13c   :  { %990 = vmatpush3.bf16.msra.mxu1 %v989_v42 }
 0x13d   :  { %1015 = vmatprep.subr.bf16.mxu1 %v1123_v0 }
 0x1f2   :  { %v209_v37 = vpop.f32.mrb[0].mxu1 }
 0x1f3   :  { %v213_v38 = vmax.f32 %v209_v37, 0.0  ;;  %v754_v39 = vpop.f32.mrb[1].mxu1 }
 0x1f5   :  { %788 = vmatmul.mubr.f32.vlgmr.msra.gmra.mrb[2].mxu0 %v213_v38 }
 0x1f6   :  { %857 = vmatprep.mubr.msk.f32.mxu0 %vm1124_vm0, %v1125_v1  ;;  %993 = vmatpush3.bf16.msra.mxu0 %v992_v46 }
 0x1f7   :  { %994 = vmatprep.subr.bf16.mxu0 %v1123_v0 }
 0x1fa   :  { %996 = vmatpush3.bf16.msra.mxu0 %v995_v48 }
 0x1fb   :  { %997 = vmatprep.subr.bf16.mxu0 %v1123_v0 }
 0x1fe   :  { %999 = vmatpush3.bf16.msra.mxu0 %v998_v51 }
 0x1ff   :  { %1000 = vmatprep.subr.bf16.mxu0 %v1123_v0 }
 0x202   :  { %1002 = vmatpush3.bf16.msra.mxu0 %v1001_v54 }
 0x203   :  { %1003 = vmatprep.subr.bf16.mxu0 %v1123_v0 }
 0x206   :  { %1005 = vmatpush3.bf16.msra.mxu0 %v1004_v57 }
 0x207   :  { %1006 = vmatprep.subr.bf16.mxu0 %v1123_v0 }
 0x20a   :  { %1008 = vmatpush3.bf16.msra.mxu0 %v1007_v60 }
 0x20b   :  { %1009 = vmatprep.subr.bf16.mxu0 %v1123_v0 }
 0x20e   :  { %1011 = vmatpush3.bf16.msra.mxu0 %v1010_v63 }
 0x20f   :  { %1012 = vmatprep.subr.bf16.mxu0 %v1123_v0 }
 0x212   :  { %1014 = vmatpush3.bf16.msra.mxu0 %v1013_v8 }
 0x2c8   :  { %v297_v2 = vpop.f32.mrb[2].mxu0 }
 0x2c9   :  { %v301_v3 = vadd.f32 %v297_v2, %v1204_v10  ;;  %v789_v4 = vpop.f32.mrb[3].mxu0  ;;  %v484_v10 = vld [vmem:[#allocation5 + $0x2a0] sm:$0xff] }
 0x2ca   :  { %v1022_v17 = vpack.c.bf16 %v485_v16, %v484_v10 }
 0x2cb   :  { %v302_v5 = vmax.f32 %v301_v3, 0.0 }
 0x2cd   :  { %823 = vmatmul.mubr.f32.vlgmr.msra.gmra.mrb[2].mxu1 %v302_v5 }
 0x2ce   :  { %892 = vmatprep.mubr.msk.f32.mxu1 %vm1124_vm0, %v1125_v1  ;;  %1017 = vmatpush3.bf16.msra.mxu1 %v1016_v13  ;;  %v486_v1 = vld [vmem:[#allocation5 + $0x2b0] sm:$0xff] }
 0x2cf   :  { %1018 = vmatprep.subr.bf16.mxu1 %v1123_v0  ;;  %v1025_v19 = vpack.c.bf16 %v487_v18, %v486_v1 }
 0x2d2   :  { %1020 = vmatpush3.bf16.msra.mxu1 %v1019_v15 }
 0x2d3   :  { %1021 = vmatprep.subr.bf16.mxu1 %v1123_v0 }
 0x2d6   :  { %1023 = vmatpush3.bf16.msra.mxu1 %v1022_v17 }
 0x2d7   :  { %1024 = vmatprep.subr.bf16.mxu1 %v1123_v0 }
 0x2da   :  { %1026 = vmatpush3.bf16.msra.mxu1 %v1025_v19 }
 0x2db   :  { %1027 = vmatprep.subr.bf16.mxu1 %v1123_v0 }
 0x2de   :  { %1029 = vmatpush3.bf16.msra.mxu1 %v1028_v22 }
 0x2df   :  { %1030 = vmatprep.subr.bf16.mxu1 %v1123_v0 }
 0x2e2   :  { %1032 = vmatpush3.bf16.msra.mxu1 %v1031_v25 }
 0x2e3   :  { %1033 = vmatprep.subr.bf16.mxu1 %v1123_v0 }
 0x2e6   :  { %1035 = vmatpush3.bf16.msra.mxu1 %v1034_v28 }
 0x2e7   :  { %1036 = vmatprep.subr.bf16.mxu1 %v1123_v0 }
 0x2ea   :  { %1038 = vmatpush3.bf16.msra.mxu1 %v1037_v34 }
 0x3a0   :  { %v386_v29 = vpop.f32.mrb[2].mxu1 }
 0x3a1   :  { %v390_v30 = vmax.f32 %v386_v29, 0.0  ;;  %v824_v31 = vpop.f32.mrb[3].mxu1 }
 0x3a3   :  { %858 = vmatmul.mubr.f32.vlgmr.msra.gmra.mrb[4].mxu0 %v390_v30 }
 0x476   :  { %v474_v35 = vpop.f32.mrb[4].mxu0 }
 0x477   :  { %v478_v36 = vadd.f32 %v474_v35, %v301_v3  ;;  %v859_v37 = vpop.f32.mrb[5].mxu0 }
 0x479   :  { %893 = vmatmul.mubr.f32.vlgmr.msra.gmra.mrb[4].mxu1 %v478_v36 }
 0x54c   :  { %v562_v38 = vpop.f32.mrb[4].mxu1 }
 0x54d   :  { %566 = vst [vmem:[#allocation7] sm:$0xff] %v562_v38  ;;  %v894_v39 = vpop.f32.mrb[5].mxu1 }
 0x54e   :  { %1102 = shalt.err (!%p1099_p6)
}
 0x54f   :  { %s1103_s10 = scalar_lea.hbm %s1251_s2, 128 }
 0x550   :  { %p1104_p7 = scmp.ne.s32.totalorder %s1251_s2, %s1103_s10  ;;  %p1107_p8 = scmp.lt.u32.totalorder %s1103_s10, %s1251_s2 }
 0x552   :  { %p1109_p9 = pnand %p1107_p8, %p1104_p7 }
 0x554   :  { %1112 = shalt.err (!%p1109_p9)
}
 0x555   :  { %576 = dma.vmem_to_hbm [thread:$0]  %s574_s6, 128, %s1251_s2, [#allocation4]  }
 0x556   :  { %1117 = dma.done.wait [#allocation4], 128  }
 0x557   :  { %1118 = vsyncadd [#allocation4], 4294967168 }
 0x558   :  { %580 = vsyncpa [#allocation3], 1 }
 0x559   :  { %581 = vsyncpa [#allocation6], 1 }
 0x55a   :  { %582 = vsyncpa [#allocation4], 1 }

</bundles_post_ra>
